<compile_context>
chip_gen: v5e
topology: v5e:2x2
jax: 0.10.0
libtpu: 0.0.40
codegen_flags: <defaults>
</compile_context>

<pallas_src>
import jax
import jax.numpy as jnp
from jax.experimental import pallas as pl
from jax.experimental.pallas import tpu as pltpu


def _time_embedding_kernel(x_ref, w1_ref, b1_ref, w2_ref, b2_ref, o_ref):
    # fc1: (TB, D) @ (D, H) on the MXU, f32 accumulation.
    x_bf = x_ref[...].astype(jnp.bfloat16)
    h = jnp.dot(x_bf, w1_ref[...], preferred_element_type=jnp.float32)
    h = h + b1_ref[...]
    # SiLU in f32: sigmoid -> EUP slot, mul -> VPU; both hide under the matmuls.
    h = h * jax.nn.sigmoid(h)
    # fc2: (TB, H) @ (H, H) on the MXU, f32 accumulation.
    out = jnp.dot(h.astype(jnp.bfloat16), w2_ref[...],
                  preferred_element_type=jnp.float32)
    out = out + b2_ref[...]
    o_ref[...] = out.astype(o_ref.dtype)


def time_embedding(x, w1, b1, w2, b2, *, block_b=256):
    """Fused TimeEmbedding forward.

    x:  (B, D)   f32
    w1: (D, 4D)  (transposed PyTorch fc1.weight)
    b1: (1, 4D)
    w2: (4D, 4D) (transposed PyTorch fc2.weight)
    b2: (1, 4D)
    returns (B, 4D) f32
    """
    B, D = x.shape
    H = 4 * D
    assert w1.shape == (D, H) and w2.shape == (H, H)
    assert b1.shape == (1, H) and b2.shape == (1, H)

    # Batch tile: multiple of 8 (sublane), at most block_b rows, at most one
    # partial tile of padding.
    tb = min(block_b, max(8, ((B + 7) // 8) * 8))
    pad_b = (-B) % tb
    if pad_b:
        x = jnp.pad(x, ((0, pad_b), (0, 0)))
    bp = B + pad_b
    grid = (bp // tb,)

    # Stream weights as bf16, keep biases f32.
    w1b = w1.astype(jnp.bfloat16)
    w2b = w2.astype(jnp.bfloat16)
    b1f = b1.astype(jnp.float32)
    b2f = b2.astype(jnp.float32)

    # VMEM budget: resident weights/biases (x2 buffers) + double-buffered
    # activation tiles; clamp into [16 MiB, 64 MiB] (valid on v5e/v6e/v7x).
    resident = 2 * (w1b.size * 2 + w2b.size * 2 + b1f.size * 4 + b2f.size * 4)
    act_tiles = 2 * 2 * (tb * D * 4 + tb * H * 4)
    vmem_limit = min(64 * 1024 * 1024,
                     max(16 * 1024 * 1024, resident + act_tiles + (2 << 20)))
    # TODO(synk): for very large embed_dim (bf16 w2 alone > ~48 MiB, i.e.
    # D >~ 1280), add a K-reduction grid axis for fc2 with a VMEM f32
    # accumulator instead of keeping w2 fully resident.

    cost = pl.CostEstimate(
        flops=2 * bp * D * H + 2 * bp * H * H,
        transcendentals=bp * H,
        bytes_accessed=(bp * D * 4 + w1b.size * 2 + w2b.size * 2
                        + b1f.size * 4 + b2f.size * 4 + bp * H * 4),
    )

    out = pl.pallas_call(
        _time_embedding_kernel,
        out_shape=jax.ShapeDtypeStruct((bp, H), jnp.float32),
        grid_spec=pltpu.PrefetchScalarGridSpec(
            num_scalar_prefetch=0,
            grid=grid,
            in_specs=[
                pl.BlockSpec((tb, D), lambda i: (i, 0)),   # x batch tile
                pl.BlockSpec((D, H), lambda i: (0, 0)),    # w1 (resident)
                pl.BlockSpec((1, H), lambda i: (0, 0)),    # b1 (resident)
                pl.BlockSpec((H, H), lambda i: (0, 0)),    # w2 (resident)
                pl.BlockSpec((1, H), lambda i: (0, 0)),    # b2 (resident)
            ],
            out_specs=pl.BlockSpec((tb, H), lambda i: (i, 0)),
        ),
        compiler_params=pltpu.CompilerParams(
            dimension_semantics=("parallel",),
            vmem_limit_bytes=vmem_limit,
        ),
        cost_estimate=cost,
    )(x, w1b, b1f, w2b, b2f)

    return out[:B] if pad_b else out


def init_params(key, embed_dim):
    """Uniform init mirroring UniformInitLinear(in, out):
    W, b ~ U(-1/sqrt(in), 1/sqrt(in)); weights stored transposed (in, out)."""
    H = 4 * embed_dim
    k1, k2, k3, k4 = jax.random.split(key, 4)
    bound1 = 1.0 / jnp.sqrt(embed_dim)
    bound2 = 1.0 / jnp.sqrt(H)
    w1 = jax.random.uniform(k1, (embed_dim, H), jnp.float32, -bound1, bound1)
    b1 = jax.random.uniform(k2, (1, H), jnp.float32, -bound1, bound1)
    w2 = jax.random.uniform(k3, (H, H), jnp.float32, -bound2, bound2)
    b2 = jax.random.uniform(k4, (1, H), jnp.float32, -bound2, bound2)
    return w1, b1, w2, b2


def reference(x, w1, b1, w2, b2):
    h = x @ w1 + b1
    h = h * jax.nn.sigmoid(h)
    return h @ w2 + b2


if __name__ == "__main__":
    key = jax.random.PRNGKey(0)
    kx, kx2, kp = jax.random.split(key, 3)

    embed_dim = 32                      # hidden = 4 * 32 = 128 (lane-aligned)
    w1, b1, w2, b2 = init_params(kp, embed_dim)

    # Case 1: tiny batch (single grid step, tb == B).
    x = jax.random.normal(kx, (8, embed_dim), jnp.float32)
    out = jax.block_until_ready(time_embedding(x, w1, b1, w2, b2))
    ref = reference(x, w1, b1, w2, b2)
    assert out.shape == (8, 4 * embed_dim)
    assert jnp.allclose(out, ref, atol=1e-2, rtol=1e-2), "mismatch (case 1)"

    # Case 2: batch not a multiple of the tile -> exercises padding + grid > 1.
    x2 = jax.random.normal(kx2, (300, embed_dim), jnp.float32)
    out2 = jax.block_until_ready(time_embedding(x2, w1, b1, w2, b2))
    ref2 = reference(x2, w1, b1, w2, b2)
    assert out2.shape == (300, 4 * embed_dim)
    assert jnp.allclose(out2, ref2, atol=1e-2, rtol=1e-2), "mismatch (case 2)"

    print("KERNEL_OK")
</pallas_src>

<mosaic_0001>
module attributes {stable_mosaic.version = 11 : i64} {
  func.func @_time_embedding_kernel(%arg0: i32, %arg1: memref<8x32xf32, #tpu.memory_space<vmem>>, %arg2: memref<32x128xbf16, #tpu.memory_space<vmem>>, %arg3: memref<1x128xf32, #tpu.memory_space<vmem>>, %arg4: memref<128x128xbf16, #tpu.memory_space<vmem>>, %arg5: memref<1x128xf32, #tpu.memory_space<vmem>>, %arg6: memref<8x128xf32, #tpu.memory_space<vmem>>) attributes {dimension_semantics = [#tpu.dimension_semantics<parallel>], iteration_bounds = array<i64: 1>, scalar_prefetch = 0 : i64, scratch_operands = 0 : i64, tpu.core_type = #tpu.core_type<tc>, window_params = [{transform_indices = @transform_0, window_bounds = array<i64: 8, 32>}, {pipeline_mode = #tpu.pipeline_mode<synchronous>, transform_indices = @transform_1, window_bounds = array<i64: 32, 128>}, {pipeline_mode = #tpu.pipeline_mode<synchronous>, transform_indices = @transform_2, window_bounds = array<i64: 1, 128>}, {pipeline_mode = #tpu.pipeline_mode<synchronous>, transform_indices = @transform_3, window_bounds = array<i64: 128, 128>}, {pipeline_mode = #tpu.pipeline_mode<synchronous>, transform_indices = @transform_4, window_bounds = array<i64: 1, 128>}, {transform_indices = @transform_5, window_bounds = array<i64: 8, 128>}]} {
    %c0 = arith.constant 0 : index
    %c0_0 = arith.constant 0 : index
    %0 = vector.load %arg1[%c0, %c0_0] : memref<8x32xf32, #tpu.memory_space<vmem>>, vector<8x32xf32>
    %1 = arith.truncf %0 : vector<8x32xf32> to vector<8x32xbf16>
    %c0_1 = arith.constant 0 : index
    %c0_2 = arith.constant 0 : index
    %2 = vector.load %arg2[%c0_1, %c0_2] : memref<32x128xbf16, #tpu.memory_space<vmem>>, vector<32x128xbf16>
    %cst = arith.constant dense<0.000000e+00> : vector<8x128xf32>
    %3 = tpu.matmul %1, %2, %cst {dimension_numbers = #tpu.dot_dimension_numbers<[1], [0], [0], [1], [0, 0, 1, 1], [], []>} : vector<8x32xbf16>, vector<32x128xbf16>, vector<8x128xf32> -> vector<8x128xf32>
    %c0_3 = arith.constant 0 : index
    %c0_4 = arith.constant 0 : index
    %4 = vector.load %arg3[%c0_3, %c0_4] : memref<1x128xf32, #tpu.memory_space<vmem>>, vector<1x128xf32>
    %5 = vector.broadcast %4 : vector<1x128xf32> to vector<8x128xf32>
    %6 = arith.addf %3, %5 : vector<8x128xf32>
    %7 = arith.negf %6 : vector<8x128xf32>
    %8 = math.exp %7 : vector<8x128xf32>
    %cst_5 = arith.constant 1.000000e+00 : f32
    %9 = vector.broadcast %cst_5 : f32 to vector<8x128xf32>
    %10 = arith.addf %9, %8 : vector<8x128xf32>
    %11 = arith.divf %9, %10 : vector<8x128xf32>
    %12 = arith.mulf %6, %11 : vector<8x128xf32>
    %13 = arith.truncf %12 : vector<8x128xf32> to vector<8x128xbf16>
    %c0_6 = arith.constant 0 : index
    %c0_7 = arith.constant 0 : index
    %14 = vector.load %arg4[%c0_6, %c0_7] : memref<128x128xbf16, #tpu.memory_space<vmem>>, vector<128x128xbf16>
    %cst_8 = arith.constant dense<0.000000e+00> : vector<8x128xf32>
    %15 = tpu.matmul %13, %14, %cst_8 {dimension_numbers = #tpu.dot_dimension_numbers<[1], [0], [0], [1], [0, 0, 1, 1], [], []>} : vector<8x128xbf16>, vector<128x128xbf16>, vector<8x128xf32> -> vector<8x128xf32>
    %c0_9 = arith.constant 0 : index
    %c0_10 = arith.constant 0 : index
    %16 = vector.load %arg5[%c0_9, %c0_10] : memref<1x128xf32, #tpu.memory_space<vmem>>, vector<1x128xf32>
    %17 = vector.broadcast %16 : vector<1x128xf32> to vector<8x128xf32>
    %18 = arith.addf %15, %17 : vector<8x128xf32>
    %c0_11 = arith.constant 0 : index
    %c0_12 = arith.constant 0 : index
    %19 = vector.load %arg6[%c0_11, %c0_12] : memref<8x128xf32, #tpu.memory_space<vmem>>, vector<8x128xf32>
    tpu.vector_store %arg6[%c0_11, %c0_12], %18 {strides = array<i32>} : memref<8x128xf32, #tpu.memory_space<vmem>>, vector<8x128xf32>,
    return
  }
  func.func @transform_0(%arg0: i32) -> (i32, i32) {
    %c0_i32 = arith.constant 0 : i32
    %c0_i32_0 = arith.constant 0 : i32
    return %arg0, %c0_i32 : i32, i32
  }
  func.func @transform_1(%arg0: i32) -> (i32, i32) {
    %c0_i32 = arith.constant 0 : i32
    %c0_i32_0 = arith.constant 0 : i32
    %c0_i32_1 = arith.constant 0 : i32
    return %c0_i32, %c0_i32_0 : i32, i32
  }
  func.func @transform_2(%arg0: i32) -> (i32, i32) {
    %c0_i32 = arith.constant 0 : i32
    %c0_i32_0 = arith.constant 0 : i32
    %c0_i32_1 = arith.constant 0 : i32
    return %c0_i32, %c0_i32_0 : i32, i32
  }
  func.func @transform_3(%arg0: i32) -> (i32, i32) {
    %c0_i32 = arith.constant 0 : i32
    %c0_i32_0 = arith.constant 0 : i32
    %c0_i32_1 = arith.constant 0 : i32
    return %c0_i32, %c0_i32_0 : i32, i32
  }
  func.func @transform_4(%arg0: i32) -> (i32, i32) {
    %c0_i32 = arith.constant 0 : i32
    %c0_i32_0 = arith.constant 0 : i32
    %c0_i32_1 = arith.constant 0 : i32
    return %c0_i32, %c0_i32_0 : i32, i32
  }
  func.func @transform_5(%arg0: i32) -> (i32, i32) {
    %c0_i32 = arith.constant 0 : i32
    %c0_i32_0 = arith.constant 0 : i32
    return %arg0, %c0_i32 : i32, i32
  }
}

</mosaic_0001>

<bundles_post_ra>
// kernel: tpu_custom_call.1
= control target key start
LH: loop header
LB: loop body
LE: loop exit
PB: predicated region body
PF: predicated region fallthrough
CT: control target
= control target key end

     0   :  { %10 = vsyncpa [#allocation3], 0  ;;  %s447_s0 = inlined_call_operand.hbm [shape: f32[8,32], index: 0, kind: input, shape index: {}]   ;;  %s448_s1 = inlined_call_operand.hbm [shape: bf16[32,128], index: 1, kind: input, shape index: {}]   ;;  %s449_s2 = inlined_call_operand.vmem [shape: f32[1,128], index: 2, kind: input, shape index: {}]   ;;  %s450_s3 = inlined_call_operand.hbm [shape: bf16[128,128], index: 3, kind: input, shape index: {}]   ;;  %s451_s4 = inlined_call_operand.vmem [shape: f32[1,128], index: 4, kind: input, shape index: {}]   ;;  %s452_s5 = inlined_call_operand.hbm [shape: f32[8,128], index: 5, kind: output, shape index: {}]  }
   0x1   :  { %11 = vsyncpa [#allocation6], 0  ;;  %s28_s20 = sshll.u32 %s448_s1, 4  ;;  %s29_s20 = int_to_ptr.hbm [resolvable:$true] %s28_s20 }
   0x2   :  { %12 = vsyncpa [#allocation4], 0  ;;  %s393_s21 = smov [#allocation5]   ;;  %s18_s25 = sshll.u32 %s447_s0, 4  ;;  %s19_s25 = int_to_ptr.hbm [resolvable:$true] %s18_s25 }
   0x3   :  { %s30_s22 = sshll.u32 %s393_s21, 4  ;;  %s394_s26 = smov 64   ;;  %s31_s22 = int_to_ptr.vmem [resolvable:$true] %s30_s22 }
   0x4   :  { %s395_s27 = smov 4   ;;  %s396_s28 = smov [#allocation2]  }
   0x5   :  { %36 = dma.hbm_to_vmem [thread:$0]  %s29_s20, 256, %s31_s22, [#allocation6], %s394_s26, %s394_s26, %s395_s27  }
   0x6   :  { %s20_s29 = sshll.u32 %s396_s28, 4  ;;  %s43_s7 = sshll.u32 %s450_s3, 4  ;;  %s21_s29 = int_to_ptr.vmem [resolvable:$true] %s20_s29  ;;  %s44_s7 = int_to_ptr.hbm [resolvable:$true] %s43_s7 }
   0x7   :  { %23 = dma.hbm_to_vmem [thread:$0]  %s19_s25, 128, %s21_s29, [#allocation3]  }
   0x8   :  { %s397_s1 = smov [#allocation7]  }
   0x9   :  { %s45_s8 = sshll.u32 %s397_s1, 4  ;;  %s46_s8 = int_to_ptr.vmem [resolvable:$true] %s45_s8 }
   0xa   :  { %51 = dma.hbm_to_vmem [thread:$0]  %s44_s7, 1024, %s46_s8, [#allocation6], %s394_s26, %s394_s26, %s395_s27  }
   0xb   :  { %387 = dma.done.wait [#allocation3], 128  }
   0xc   :  { %388 = vsyncadd [#allocation3], 4294967168 }
   0xd   :  { %389 = dma.done.wait [#allocation6], 1280  }
   0xe   :  { %390 = vsyncadd [#allocation6], 4294966016  ;;  %v270_v0 = vld [vmem:[#allocation5 + $0x8] sm:$0xff]  ;;  %v269_v1 = vld [vmem:[#allocation5] sm:$0xff]  ;;  %vm89_vm0 = vcmask 261120   ;;  %s398_s10 = smov [#allocation8]  }
   0xf   :  { %99 = vmatpush.bf16.msra.mxu0 %v270_v0  ;;  %v67_v2 = vld [vmem:[#allocation2] sm:$0xff]  ;;  %v278_v4 = vld [vmem:[#allocation7 + $0x38] sm:$0xff]  ;;  %v277_v5 = vld [vmem:[#allocation7 + $0x30] sm:$0xff]  ;;  %s214_s11 = sshll.u32 %s398_s10, 4  ;;  %s216_s14 = sshll.u32 %s452_s5, 4  ;;  %s215_s11 = int_to_ptr.vmem [resolvable:$true] %s214_s11  ;;  %s217_s14 = int_to_ptr.hbm [resolvable:$true] %s216_s14 }
  0x10   :  { %v68_v3 = vpack.c.bf16 %v67_v2, %v67_v2  ;;  %195 = vmatpush.bf16.msra.mxu1 %v278_v4  ;;  %v276_v6 = vld [vmem:[#allocation7 + $0x28] sm:$0xff]  ;;  %v275_v7 = vld [vmem:[#allocation7 + $0x20] sm:$0xff]  ;;  %v274_v8 = vld [vmem:[#allocation7 + $0x18] sm:$0xff] }
  0x11   :  { %v273_v9 = vld [vmem:[#allocation7 + $0x10] sm:$0xff]  ;;  %v272_v10 = vld [vmem:[#allocation7 + $0x8] sm:$0xff]  ;;  %v271_v11 = vld [vmem:[#allocation7] sm:$0xff] }
  0x12   :  { %v285_v12 = vld [vmem:[%s449_s2] ss:$0 sm:$0xff] }
  0x13   :  { %100 = vmatpush.bf16.msra.mxu0 %v269_v1  ;;  %v286_v31 = vld [vmem:[%s451_s4] ss:$0 sm:$0xff] }
  0x14   :  { %196 = vmatpush.bf16.msra.mxu1 %v277_v5 }
  0x16   :  { %235 = vmatmul.msk.bf16.vlgmr.msra.gmra.mxu0 %vm89_vm0, %v68_v3 }
  0x18   :  { %197 = vmatpush.bf16.msra.mxu1 %v276_v6 }
  0x1c   :  { %198 = vmatpush.bf16.msra.mxu1 %v275_v7 }
  0x20   :  { %199 = vmatpush.bf16.msra.mxu1 %v274_v8 }
  0x24   :  { %200 = vmatpush.bf16.msra.mxu1 %v273_v9 }
  0x28   :  { %201 = vmatpush.bf16.msra.mxu1 %v272_v10 }
  0x2c   :  { %202 = vmatpush.bf16.msra.mxu1 %v271_v11 }
  0x93   :  { %v102_v13 = vpop.f32.mrf.mxu0 }
  0x94   :  { %v103_v14 = vadd.f32 %v285_v12, %v102_v13 }
  0x96   :  { %v236_v15 = vmul.f32 -1.442695, %v103_v14 }
  0x98   :  { %287 = vpow2.f32 %v236_v15 }
  0x9b   :  { %v104_v16 = vpop.f32.mrf.mxu0 }
  0x9e   :  { %v288_v17 = vpop.eup %287 }
  0x9f   :  { %v109_v18 = vadd.f32 1.0, %v288_v17 }
  0xa1   :  { %289 = vrcp.f32 %v109_v18  ;;  %v121_v22 = vand.u32 2147483648, %v109_v18  ;;  %v119_v24 = vand.u32 2147483647, %v109_v18  ;;  %vm115_vm2 = vweird.f32 %v109_v18 }
  0xa3   :  { %v122_v26 = vor.u32 1.1754944e-38, %v121_v22  ;;  %vm120_vm4 = vcmp.eq.f32.partialorder %v119_v24, 8.507059e+37 }
  0xa7   :  { %v290_v19 = vpop.eup %289 }
  0xa8   :  { %v111_v20 = vmul.f32 %v290_v19, %v109_v18  ;;  %vm116_vm1 = vweird.f32 %v290_v19 }
  0xa9   :  { %vm117_vm3 = vmor %vm115_vm2, %vm116_vm1 }
  0xaa   :  { %v112_v21 = vsub.f32 1.0, %v111_v20 }
  0xac   :  { %v113_v23 = vmul.f32 %v290_v19, %v112_v21 }
  0xae   :  { %v114_v25 = vadd.f32 %v290_v19, %v113_v23 }
  0xb0   :  { %v118_v27 = vsel %vm117_vm3, %v290_v19, %v114_v25 }
  0xb1   :  { %v123_v28 = vsel %vm120_vm4, %v122_v26, %v118_v27 }
  0xb2   :  { %v125_v29 = vmul.f32 %v123_v28, %v103_v14 }
  0xb4   :  { %v126_v30 = vpack.c.bf16 %v125_v29, %v125_v29 }
  0xb6   :  { %203 = vmatmul.bf16.vlgmr.msra.gmra.mxu1 %v126_v30 }
 0x133   :  { %v204_v32 = vpop.f32.mrf.mxu1 }
 0x134   :  { %v205_v33 = vadd.f32 %v286_v31, %v204_v32 }
 0x136   :  { %208 = vst [vmem:[#allocation8] sm:$0xff] %v205_v33 }
 0x137   :  { %219 = dma.vmem_to_hbm [thread:$0]  %s215_s11, 128, %s217_s14, [#allocation4]  }
 0x13b   :  { %v206_v34 = vpop.f32.mrf.mxu1 }
 0x13c   :  { %391 = dma.done.wait [#allocation4], 128  }
 0x13d   :  { %392 = vsyncadd [#allocation4], 4294967168 }
 0x13e   :  { %224 = vsyncpa [#allocation3], 1 }
 0x13f   :  { %225 = vsyncpa [#allocation6], 1 }
 0x140   :  { %226 = vsyncpa [#allocation4], 1 }

</bundles_post_ra>
